<compile_context>
chip_gen: v6e
topology: v6e:2x2x1
jax: 0.10.0
libtpu: 0.0.40
codegen_flags: <defaults>
</compile_context>

<pallas_src>
import functools

import jax
import jax.numpy as jnp
from jax.experimental import pallas as pl
from jax.experimental.pallas import tpu as pltpu


# bf16 MXU operands + f32 accumulation: 2x MXU throughput on v6e/v7x, half the
# VMEM/DMA bytes.  Set to jnp.float32 to restore exact f32 matmul semantics.
_MXU_DTYPE = jnp.bfloat16
# storage dtype for inter-kernel activations that only feed MXU operands
_ACT_DTYPE = jnp.bfloat16


def _default_vmem_limit():
    # ~3/4 of physical VMEM: 96 MiB on v5e/v6e (128 MiB), 48 MiB on v7x (64 MiB).
    try:
        cap = int(pltpu.get_tpu_info().vmem_capacity_bytes)
    except Exception:
        cap = 64 * 1024 * 1024
    return min((cap * 3) // 4, 100 * 1024 * 1024)


_VMEM_LIMIT = _default_vmem_limit()


def _round_up(x, m):
    return ((x + m - 1) // m) * m


def _pad_rows(x, rows):
    if x.shape[0] == rows:
        return x
    return jnp.pad(x, ((0, rows - x.shape[0]),) + ((0, 0),) * (x.ndim - 1))


# ----------------------------------------------------------------------------
# Fused linear kernel: y = x @ w + b  (+relu) (+residual) (+layernorm)
# ----------------------------------------------------------------------------
def _linear_kernel(*refs, activation, residual, layernorm):
    x_ref, w_ref, b_ref = refs[0], refs[1], refs[2]
    i = 3
    res_ref = None
    if residual:
        res_ref = refs[i]
        i += 1
    g_ref = be_ref = None
    if layernorm:
        g_ref, be_ref = refs[i], refs[i + 1]
        i += 2
    o_ref = refs[i]

    x = x_ref[...]
    if x.dtype != _MXU_DTYPE:
        x = x.astype(_MXU_DTYPE)
    # weights are pre-cast to bf16 in the wrapper -> no per-tile cast here
    y = jnp.dot(x, w_ref[...], preferred_element_type=jnp.float32)
    y = y + b_ref[...].astype(jnp.float32)
    if activation == "relu":
        y = jnp.maximum(y, 0.0)
    if residual:
        y = y + res_ref[...].astype(jnp.float32)
    if layernorm:
        # single-pass statistics: var = E[x^2] - mu^2
        mu = jnp.mean(y, axis=-1, keepdims=True)
        ms = jnp.mean(y * y, axis=-1, keepdims=True)
        var = ms - mu * mu
        y = (y - mu) * jax.lax.rsqrt(var + 1e-5)
        y = y * g_ref[...].astype(jnp.float32) + be_ref[...].astype(jnp.float32)
    o_ref[...] = y.astype(o_ref.dtype)


def linear_pallas(x, w, b, *, activation=None, residual=None, ln=None,
                  row_tile=512, out_dtype=None):
    """w stored [in, out].  Optional relu / residual add / fused layernorm."""
    M, K = x.shape
    N = w.shape[1]
    out_dtype = out_dtype or x.dtype
    TM = min(row_tile, _round_up(M, 8))
    Mp = _round_up(M, TM)

    w = w.astype(_MXU_DTYPE)          # pre-cast once (hoisted out of the grid loop)

    operands = [_pad_rows(x, Mp), w, b.reshape(1, N)]
    in_specs = [
        pl.BlockSpec((TM, K), lambda i: (i, 0)),
        pl.BlockSpec((K, N), lambda i: (0, 0)),
        pl.BlockSpec((1, N), lambda i: (0, 0)),
    ]
    if residual is not None:
        operands.append(_pad_rows(residual, Mp))
        in_specs.append(pl.BlockSpec((TM, N), lambda i: (i, 0)))
    if ln is not None:
        gamma, beta = ln
        operands += [gamma.reshape(1, N), beta.reshape(1, N)]
        in_specs += [pl.BlockSpec((1, N), lambda i: (0, 0)),
                     pl.BlockSpec((1, N), lambda i: (0, 0))]

    out = pl.pallas_call(
        functools.partial(_linear_kernel, activation=activation,
                          residual=residual is not None, layernorm=ln is not None),
        out_shape=jax.ShapeDtypeStruct((Mp, N), out_dtype),
        grid=(Mp // TM,),
        in_specs=in_specs,
        out_specs=pl.BlockSpec((TM, N), lambda i: (i, 0)),
        compiler_params=pltpu.CompilerParams(
            dimension_semantics=("parallel",), vmem_limit_bytes=_VMEM_LIMIT),
    )(*operands)
    return out[:M] if Mp != M else out


# ----------------------------------------------------------------------------
# Fused query-side projection: (q + pos) @ [so_w | aw_w] + b, masked softmax on
# the attention-logit columns (pl.reciprocal -> EUP).  Output columns are
# zero-padded to a multiple of 128 -> lane-dense stores / full MXU width.
# Matmul kept in f32: sampling offsets feed bilinear sample positions.
# ----------------------------------------------------------------------------
def _qproj_kernel(q_ref, pos_ref, w_ref, b_ref, o_ref, *, n_so, n_valid):
    qp = q_ref[...].astype(jnp.float32) + pos_ref[...].astype(jnp.float32)
    y = jnp.dot(qp, w_ref[...], preferred_element_type=jnp.float32)
    y = y + b_ref[...].astype(jnp.float32)
    # columns [0, n_so): sampling offsets (pass-through)
    # columns [n_so, n_valid): attention logits -> masked softmax
    # columns [n_valid, :): lane padding (zeros, sliced off by the wrapper)
    col = jax.lax.broadcasted_iota(jnp.int32, y.shape, 1)
    is_logit = (col >= n_so) & (col < n_valid)
    m = jnp.max(jnp.where(is_logit, y, -1e30), axis=-1, keepdims=True)
    e = jnp.exp(jnp.where(is_logit, y - m, -1e30))
    attn = e * pl.reciprocal(jnp.sum(e, axis=-1, keepdims=True), approx=True)
    o_ref[...] = jnp.where(is_logit, attn, y).astype(o_ref.dtype)


def qproj_pallas(q, qpos, wcat, bcat, n_so, *, row_tile=512):
    M, K = q.shape
    Nc = wcat.shape[1]
    Np = _round_up(Nc, 128)
    if Np != Nc:
        wcat = jnp.pad(wcat, ((0, 0), (0, Np - Nc)))
        bcat = jnp.pad(bcat, (0, Np - Nc))
    TM = min(row_tile, _round_up(M, 8))
    Mp = _round_up(M, TM)
    out = pl.pallas_call(
        functools.partial(_qproj_kernel, n_so=n_so, n_valid=Nc),
        out_shape=jax.ShapeDtypeStruct((Mp, Np), jnp.float32),
        grid=(Mp // TM,),
        in_specs=[pl.BlockSpec((TM, K), lambda i: (i, 0)),
                  pl.BlockSpec((TM, K), lambda i: (i, 0)),
                  pl.BlockSpec((K, Np), lambda i: (0, 0)),
                  pl.BlockSpec((1, Np), lambda i: (0, 0))],
        out_specs=pl.BlockSpec((TM, Np), lambda i: (i, 0)),
        compiler_params=pltpu.CompilerParams(
            dimension_semantics=("parallel",), vmem_limit_bytes=_VMEM_LIMIT),
    )(_pad_rows(q, Mp), _pad_rows(qpos, Mp), wcat, bcat.reshape(1, Np))
    return out[:M, :Nc]


# ----------------------------------------------------------------------------
# Deformable-attention aggregation (num_heads == 1), per-level + Q-tiled.
# grid = (Q_tiles, L); per step: build [TQ, HW] bilinear/attention weights for
# a single level and accumulate one MXU matmul against that level's value slab
# into an f32 VMEM scratch.  The value slab is bf16 and (if it fits) kept
# VMEM-resident across the whole grid.
# ----------------------------------------------------------------------------
def _deform_agg_kernel(lx_ref, ly_ref, a_ref, v_ref, o_ref, acc_ref,
                       *, H, W, P, value_resident):
    lvl = pl.program_id(1)

    @pl.when(lvl == 0)
    def _():
        acc_ref[...] = jnp.zeros_like(acc_ref)

    lx = lx_ref[...].astype(jnp.float32)                 # [TQ, P]
    ly = ly_ref[...].astype(jnp.float32)
    ap = a_ref[...].astype(jnp.float32)

    if value_resident:
        v = v_ref[lvl]                                   # [HW, C], VMEM-resident
    else:
        v = v_ref[...]                                   # [HW, C], streamed per level
    if v.dtype != _MXU_DTYPE:
        v = v.astype(_MXU_DTYPE)

    TQ = lx.shape[0]
    HW = v.shape[0]

    # grid_sample(align_corners=False): pixel = loc * size - 0.5
    x = lx * float(W) - 0.5                              # [TQ, P]
    y = ly * float(H) - 0.5
    x0f = jnp.floor(x)
    y0f = jnp.floor(y)
    fx = x - x0f
    fy = y - y0f
    # clamp only for index arithmetic (avoids int32 overflow for the -1e6
    # masked reference points); fully OOB points simply never match below.
    x0 = jnp.clip(x0f, -2.0, float(W)).astype(jnp.int32)
    y0 = jnp.clip(y0f, -2.0, float(H)).astype(jnp.int32)
    # fold the attention weight into the row weights ([TQ, P], cheap VALU)
    wy0 = (1.0 - fy) * ap
    wy1 = fy * ap

    # row / column index of every flat HW column (computed once per step)
    flat = jax.lax.broadcasted_iota(jnp.int32, (1, HW), 1)
    r_ids = flat // W
    c_ids = flat % W

    # One accumulate per point (separable row-mask * col-mask), ~10 full-tile
    # VPU ops/point vs 12 for per-corner one-hot adds.  Out-of-bounds corners
    # (x<0, x>W-1, y<0, y>H-1) never match an index -> zero padding for free.
    # P is tiny (4): a static loop keeps only one [TQ,HW] temp live per iter.
    wmat = jnp.zeros((TQ, HW), jnp.float32)
    for p in range(P):
        y0p = y0[:, p:p + 1]
        x0p = x0[:, p:p + 1]
        rw = jnp.where(r_ids == y0p, wy0[:, p:p + 1],
                       jnp.where(r_ids == y0p + 1, wy1[:, p:p + 1], 0.0))
        cw = jnp.where(c_ids == x0p, 1.0 - fx[:, p:p + 1],
                       jnp.where(c_ids == x0p + 1, fx[:, p:p + 1], 0.0))
        wmat = wmat + rw * cw

    acc_ref[...] += jnp.dot(wmat.astype(_MXU_DTYPE), v,
                            preferred_element_type=jnp.float32)

    @pl.when(lvl == pl.num_programs(1) - 1)
    def _():
        o_ref[...] = acc_ref[...].astype(o_ref.dtype)


def deform_attn_core_pallas(loc_x, loc_y, attn, value, H, W, *, q_tile=128):
    """loc_x, loc_y, attn: [L, Q, P] (per-level layout); value: [L, HW, C]."""
    L, Q, P = loc_x.shape
    HW, C = value.shape[1], value.shape[2]
    TQ = min(q_tile, _round_up(Q, 8))
    Qp = _round_up(Q, TQ)
    if Qp != Q:
        pad = ((0, 0), (0, Qp - Q), (0, 0))
        loc_x = jnp.pad(loc_x, pad, constant_values=-1e6)   # out-of-bounds -> 0
        loc_y = jnp.pad(loc_y, pad, constant_values=-1e6)
        attn = jnp.pad(attn, pad)

    if value.dtype != _MXU_DTYPE:
        value = value.astype(_MXU_DTYPE)      # half the bytes moved / kept resident

    # Keep the whole multi-level value slab VMEM-resident (constant block index
    # -> one DMA total) when it comfortably fits; otherwise stream per level.
    value_bytes = L * HW * C * jnp.dtype(value.dtype).itemsize
    value_resident = (2 * value_bytes) <= (_VMEM_LIMIT // 2)
    if value_resident:
        v_spec = pl.BlockSpec((L, HW, C), lambda i, l: (0, 0, 0))
    else:
        v_spec = pl.BlockSpec((None, HW, C), lambda i, l: (l, 0, 0))

    loc_spec = pl.BlockSpec((None, TQ, P), lambda i, l: (l, i, 0))
    out = pl.pallas_call(
        functools.partial(_deform_agg_kernel, H=H, W=W, P=P,
                          value_resident=value_resident),
        out_shape=jax.ShapeDtypeStruct((Qp, C), _ACT_DTYPE),
        grid=(Qp // TQ, L),
        in_specs=[loc_spec, loc_spec, loc_spec, v_spec],
        out_specs=pl.BlockSpec((TQ, C), lambda i, l: (i, 0)),
        scratch_shapes=[pltpu.VMEM((TQ, C), jnp.float32)],
        compiler_params=pltpu.CompilerParams(
            dimension_semantics=("parallel", "arbitrary"),
            vmem_limit_bytes=_VMEM_LIMIT),
    )(loc_x, loc_y, attn, value)
    return out[:Q] if Qp != Q else out


# ----------------------------------------------------------------------------
# Module forward passes (glue in JAX, compute in Pallas kernels above)
# ----------------------------------------------------------------------------
def defor_attn_forward(p, query, query_pos, value, reference_points, H, W, ln=None):
    """DeforAttn.forward (batch dim dropped) with the following LayerNorm fused.

    query, query_pos: [Q, C]; value: [N, Q, C]; reference_points: [Q, L_ref, 2].
    """
    Q, C = query.shape
    N = value.shape[0]
    P = p["num_points"]
    identity = query

    # value projection (all agents/levels in one tiled matmul), bf16 output
    v = linear_pallas(value.reshape(N * Q, C), p["vp_w"], p["vp_b"],
                      out_dtype=_ACT_DTYPE).reshape(N, Q, C)

    # fused sampling-offset + attention-weight projection (+ softmax in-kernel).
    # The [:N] level slice is folded into the weight columns (level-major layout
    # matches the reference reshape [heads=1, levels, points, (2)]).
    n_so = N * P * 2
    wcat = jnp.concatenate([p["so_w"][:, :n_so], p["aw_w"][:, :N * P]], axis=1)
    bcat = jnp.concatenate([p["so_b"][:n_so], p["aw_b"][:N * P]], axis=0)
    y = qproj_pallas(query, query_pos, wcat, bcat, n_so)           # [Q, N*P*3]
    so = y[:, :n_so].reshape(Q, N, P, 2)
    attn = y[:, n_so:].reshape(Q, N, P)

    offset_normalizer = jnp.array([float(W), float(H)], jnp.float32)    # (w, h)
    loc = reference_points[:, :, None, :] + so / offset_normalizer      # [Q, N, P, 2]
    loc_x = jnp.transpose(loc[..., 0], (1, 0, 2))                       # [N, Q, P]
    loc_y = jnp.transpose(loc[..., 1], (1, 0, 2))
    attn_l = jnp.transpose(attn, (1, 0, 2))                             # [N, Q, P]

    agg = deform_attn_core_pallas(loc_x, loc_y, attn_l, v, H, W)        # [Q, C] bf16

    # output projection + residual (+ post-LayerNorm) fused in one kernel.
    # dropout = identity (eval).
    return linear_pallas(agg, p["op_w"], p["op_b"], residual=identity, ln=ln,
                         out_dtype=query.dtype)


def ffn_forward(p, x, ln=None):
    h = linear_pallas(x, p["w1"], p["b1"], activation="relu", out_dtype=_ACT_DTYPE)
    return linear_pallas(h, p["w2"], p["b2"], residual=x, ln=ln, out_dtype=x.dtype)


def block_forward(bp, query, query_pos, value, ref_2d, H, W):
    # cfgs = ['self_attn', 'norm', 'cross_attn', 'norm', 'ffn', 'norm']
    # (each 'norm' is fused into the preceding attn / ffn output kernel)
    q = defor_attn_forward(bp["self_attn"], query, query_pos, query[None],
                           ref_2d[:, :1, :], H, W, ln=bp["norm1"])
    q = defor_attn_forward(bp["cross_attn"], q, query_pos, value, ref_2d, H, W,
                           ln=bp["norm2"])
    q = ffn_forward(bp["ffn"], q, ln=bp["norm3"])
    return q


def positional_encoding(col_embed, row_embed, h, w):
    nf = col_embed.shape[-1]
    pos = jnp.concatenate(
        [jnp.broadcast_to(col_embed[None, :, :], (h, w, nf)),
         jnp.broadcast_to(row_embed[:, None, :], (h, w, nf))], axis=-1)  # [h, w, 2*nf]
    return pos.reshape(h * w, 2 * nf)                                    # [HW, C]


def get_reference_points_2d(H, W):
    ref_y, ref_x = jnp.meshgrid(jnp.linspace(0.5, H - 0.5, H),
                                jnp.linspace(0.5, W - 0.5, W), indexing="ij")
    ref_y = ref_y.reshape(-1) / H
    ref_x = ref_x.reshape(-1) / W
    ref_2d = jnp.stack([ref_x, ref_y], axis=-1)                          # [HW, 2]
    return ref_2d[:, None, :].astype(jnp.float32)                        # [HW, 1, 2]


def warp_affine_simple(src, M, dsize):
    """Bilinear affine warp (F.affine_grid + F.grid_sample, align_corners=False)."""
    N, C, H, W = src.shape
    Ho, Wo = dsize
    xs = (2.0 * jnp.arange(Wo, dtype=jnp.float32) + 1.0) / Wo - 1.0
    ys = (2.0 * jnp.arange(Ho, dtype=jnp.float32) + 1.0) / Ho - 1.0
    gx, gy = jnp.meshgrid(xs, ys)
    base = jnp.stack([gx, gy, jnp.ones_like(gx)], axis=-1)               # [Ho, Wo, 3]
    grid = jnp.einsum("nij,hwj->nhwi", M.astype(jnp.float32), base)      # [N, Ho, Wo, 2]
    px = ((grid[..., 0] + 1.0) * W - 1.0) / 2.0
    py = ((grid[..., 1] + 1.0) * H - 1.0) / 2.0
    x0 = jnp.floor(px)
    y0 = jnp.floor(py)
    out = jnp.zeros((N, C, Ho, Wo), src.dtype)
    src_flat = src.reshape(N, C, H * W)
    for dy in (0, 1):
        for dx in (0, 1):
            cx = x0 + dx
            cy = y0 + dy
            wgt = (1.0 - jnp.abs(px - cx)) * (1.0 - jnp.abs(py - cy))
            inb = (cx >= 0) & (cx <= W - 1) & (cy >= 0) & (cy <= H - 1)
            idx = (jnp.clip(cy, 0, H - 1) * W + jnp.clip(cx, 0, W - 1)).astype(jnp.int32)
            gathered = jnp.take_along_axis(
                src_flat, idx.reshape(N, 1, Ho * Wo), axis=2).reshape(N, C, Ho, Wo)
            out = out + gathered * jnp.where(inb, wgt, 0.0)[:, None, :, :]
    return out


def defor_encoder_forward(params, x, record_len, pairwise_t_matrix,
                          offsets, offset_masks, cfg):
    """DeforEncoder.forward.  x: [sum(record_len), C, H, W] (NCHW)."""
    C, H, W = x.shape[1:]
    bev_h, bev_w = cfg["bev_h"], cfg["bev_w"]
    HW = bev_h * bev_w

    if cfg.get("calibrate", False) and offsets is not None:
        offsets = jnp.stack([offsets[..., 0] / W, offsets[..., 1] / H], axis=-1)

    # regroup (host-side Python loop over record_len, matching torch.tensor_split)
    split_points, acc = [], 0
    for r in record_len[:-1]:
        acc += int(r)
        split_points.append(acc)
    split_x = jnp.split(x, split_points, axis=0)

    out = []
    for b, xx in enumerate(split_x):
        N = xx.shape[0]
        bev_queries = params["bev_embedding"].astype(xx.dtype)              # [HW, C]
        bev_pos = positional_encoding(params["col_embed"], params["row_embed"],
                                      bev_h, bev_w).astype(xx.dtype)        # [HW, C]

        t_matrix = pairwise_t_matrix[b][:N, :N, :, :]
        xx = warp_affine_simple(xx, t_matrix[0], (H, W))

        ref_2d = get_reference_points_2d(H, W)                              # [HW, 1, 2]
        if offsets is not None and offset_masks is not None and N > 1:
            offset = offsets[b].reshape(HW, 2)[:, None, :]                  # [HW, 1, 2]
            offset_mask = offset_masks[b].reshape(HW)
            ref_2d_ = ref_2d + offset
            ref_2d_ = jnp.where((offset_mask != 0)[:, None, None], -1000000.0, ref_2d_)
            ref_2d = jnp.concatenate([ref_2d, ref_2d_], axis=1)             # [HW, 2, 2]
        else:
            ref_2d = jnp.tile(ref_2d, (1, N, 1))                            # [HW, N, 2]

        xx = xx + params["feature_embeds"][:N, :, None, None]
        xx = xx.reshape(N, C, H * W).transpose(0, 2, 1)                     # [N, HW, C]

        q = bev_queries
        for bp in params["blocks"]:
            q = block_forward(bp, q, bev_pos, xx, ref_2d, H, W)

        out.append(q.T.reshape(1, C, H, W))                                 # back to NCHW
    return jnp.concatenate(out, axis=0)


# ----------------------------------------------------------------------------
# Deterministic parameter initialization (shapes from the module __init__)
# ----------------------------------------------------------------------------
def _init_linear(key, in_dim, out_dim, scale=0.05):
    w = scale * jax.random.normal(key, (in_dim, out_dim), jnp.float32)       # stored [in, out]
    b = jnp.zeros((out_dim,), jnp.float32)
    return w, b


def init_defor_attn(key, embed_dims, num_points, max_num_levels, num_heads=1):
    assert num_heads == 1  # TODO(synk): multi-head (>1) deformable attention not implemented
    ks = jax.random.split(key, 4)
    so_w, so_b = _init_linear(ks[0], embed_dims, max_num_levels * num_heads * num_points * 2)
    aw_w, aw_b = _init_linear(ks[1], embed_dims, max_num_levels * num_heads * num_points)
    vp_w, vp_b = _init_linear(ks[2], embed_dims, embed_dims)
    op_w, op_b = _init_linear(ks[3], embed_dims, embed_dims)
    return dict(so_w=so_w, so_b=so_b, aw_w=aw_w, aw_b=aw_b,
                vp_w=vp_w, vp_b=vp_b, op_w=op_w, op_b=op_b,
                num_points=num_points, max_num_levels=max_num_levels)


def init_ffn(key, embed_dims, feedforward_channels):
    k1, k2 = jax.random.split(key)
    w1, b1 = _init_linear(k1, embed_dims, feedforward_channels)
    w2, b2 = _init_linear(k2, feedforward_channels, embed_dims)
    return dict(w1=w1, b1=b1, w2=w2, b2=b2)


def init_block(key, embed_dims, num_heads_self=1, num_points_self=4,
               num_heads_cross=1, num_points_cross=4, dropout=0.1, max_num_levels=2):
    ks = jax.random.split(key, 3)
    return {
        "self_attn": init_defor_attn(ks[0], embed_dims, num_points_self, 1, num_heads_self),
        "norm1": (jnp.ones((embed_dims,), jnp.float32), jnp.zeros((embed_dims,), jnp.float32)),
        "cross_attn": init_defor_attn(ks[1], embed_dims, num_points_cross, max_num_levels,
                                      num_heads_cross),
        "norm2": (jnp.ones((embed_dims,), jnp.float32), jnp.zeros((embed_dims,), jnp.float32)),
        "ffn": init_ffn(ks[2], embed_dims, embed_dims * 4),
        "norm3": (jnp.ones((embed_dims,), jnp.float32), jnp.zeros((embed_dims,), jnp.float32)),
    }


def init_params(key, cfg):
    C = cfg["embed_dims"]
    bev_h, bev_w = cfg["bev_h"], cfg["bev_w"]
    nf = C // 2
    keys = jax.random.split(key, 4 + len(cfg["block_cfgs"]))
    params = {
        "bev_embedding": 0.02 * jax.random.normal(keys[0], (bev_h * bev_w, C), jnp.float32),
        "row_embed": 0.02 * jax.random.normal(keys[1], (bev_h, nf), jnp.float32),
        "col_embed": 0.02 * jax.random.normal(keys[2], (bev_w, nf), jnp.float32),
        "feature_embeds": jax.random.normal(keys[3], (cfg["max_num_agent"], C), jnp.float32),
        "blocks": [init_block(keys[4 + i], *bc) for i, bc in enumerate(cfg["block_cfgs"])],
    }
    return params


# ----------------------------------------------------------------------------
if __name__ == "__main__":
    cfg = dict(
        block_cfgs=[[32], [32]],   # two Blocks with default heads/points/levels
        bev_h=8, bev_w=8,
        embed_dims=32,
        max_num_agent=5,
    )
    key = jax.random.PRNGKey(0)
    kp, kx, ko, km = jax.random.split(key, 4)

    params = init_params(kp, cfg)

    C, H, W = cfg["embed_dims"], cfg["bev_h"], cfg["bev_w"]
    record_len = [2]                                   # one group of N=2 agents
    x = jax.random.normal(kx, (sum(record_len), C, H, W), jnp.float32)

    L = cfg["max_num_agent"]
    eye23 = jnp.array([[1.0, 0.0, 0.0], [0.0, 1.0, 0.0]], jnp.float32)
    pairwise_t_matrix = jnp.broadcast_to(eye23, (len(record_len), L, L, 2, 3))

    offsets = 0.1 * jax.random.normal(ko, (len(record_len), H, W, 2), jnp.float32)
    offset_masks = (jax.random.uniform(km, (len(record_len), H, W)) > 0.8).astype(jnp.float32)

    out = defor_encoder_forward(params, x, record_len, pairwise_t_matrix,
                                offsets, offset_masks, cfg)
    out = jax.block_until_ready(out)
    assert out.shape == (len(record_len), C, H, W), out.shape
    assert bool(jnp.all(jnp.isfinite(out)))
    print("KERNEL_OK")
</pallas_src>

<mosaic_0001>
module attributes {stable_mosaic.version = 11 : i64} {
  func.func @_linear_kernel(%arg0: i32, %arg1: memref<64x32xf32, #tpu.memory_space<vmem>>, %arg2: memref<32x32xbf16, #tpu.memory_space<vmem>>, %arg3: memref<1x32xf32, #tpu.memory_space<vmem>>, %arg4: memref<64x32xbf16, #tpu.memory_space<vmem>>) attributes {dimension_semantics = [#tpu.dimension_semantics<parallel>], iteration_bounds = array<i64: 1>, scalar_prefetch = 0 : i64, scratch_operands = 0 : i64, tpu.core_type = #tpu.core_type<tc>, window_params = [{transform_indices = @transform_0, window_bounds = array<i64: 64, 32>}, {pipeline_mode = #tpu.pipeline_mode<synchronous>, transform_indices = @transform_1, window_bounds = array<i64: 32, 32>}, {pipeline_mode = #tpu.pipeline_mode<synchronous>, transform_indices = @transform_2, window_bounds = array<i64: 1, 32>}, {transform_indices = @transform_3, window_bounds = array<i64: 64, 32>}]} {
    %c0 = arith.constant 0 : index
    %c0_0 = arith.constant 0 : index
    %0 = vector.load %arg1[%c0, %c0_0] : memref<64x32xf32, #tpu.memory_space<vmem>>, vector<64x32xf32>
    %1 = arith.truncf %0 : vector<64x32xf32> to vector<64x32xbf16>
    %c0_1 = arith.constant 0 : index
    %c0_2 = arith.constant 0 : index
    %2 = vector.load %arg2[%c0_1, %c0_2] : memref<32x32xbf16, #tpu.memory_space<vmem>>, vector<32x32xbf16>
    %cst = arith.constant dense<0.000000e+00> : vector<64x32xf32>
    %3 = tpu.matmul %1, %2, %cst {dimension_numbers = #tpu.dot_dimension_numbers<[1], [0], [0], [1], [0, 0, 1, 1], [], []>} : vector<64x32xbf16>, vector<32x32xbf16>, vector<64x32xf32> -> vector<64x32xf32>
    %c0_3 = arith.constant 0 : index
    %c0_4 = arith.constant 0 : index
    %4 = vector.load %arg3[%c0_3, %c0_4] : memref<1x32xf32, #tpu.memory_space<vmem>>, vector<1x32xf32>
    %5 = vector.broadcast %4 : vector<1x32xf32> to vector<64x32xf32>
    %6 = arith.addf %3, %5 : vector<64x32xf32>
    %7 = arith.truncf %6 : vector<64x32xf32> to vector<64x32xbf16>
    %c0_5 = arith.constant 0 : index
    %c0_6 = arith.constant 0 : index
    %8 = vector.load %arg4[%c0_5, %c0_6] : memref<64x32xbf16, #tpu.memory_space<vmem>>, vector<64x32xbf16>
    tpu.vector_store %arg4[%c0_5, %c0_6], %7 {strides = array<i32>} : memref<64x32xbf16, #tpu.memory_space<vmem>>, vector<64x32xbf16>,
    return
  }
  func.func @transform_0(%arg0: i32) -> (i32, i32) {
    %c0_i32 = arith.constant 0 : i32
    %c0_i32_0 = arith.constant 0 : i32
    return %arg0, %c0_i32 : i32, i32
  }
  func.func @transform_1(%arg0: i32) -> (i32, i32) {
    %c0_i32 = arith.constant 0 : i32
    %c0_i32_0 = arith.constant 0 : i32
    %c0_i32_1 = arith.constant 0 : i32
    return %c0_i32, %c0_i32_0 : i32, i32
  }
  func.func @transform_2(%arg0: i32) -> (i32, i32) {
    %c0_i32 = arith.constant 0 : i32
    %c0_i32_0 = arith.constant 0 : i32
    %c0_i32_1 = arith.constant 0 : i32
    return %c0_i32, %c0_i32_0 : i32, i32
  }
  func.func @transform_3(%arg0: i32) -> (i32, i32) {
    %c0_i32 = arith.constant 0 : i32
    %c0_i32_0 = arith.constant 0 : i32
    return %arg0, %c0_i32 : i32, i32
  }
}

</mosaic_0001>

<bundles_post_ra>
// kernel: tpu_custom_call.1
= control target key start
LH: loop header
LB: loop body
LE: loop exit
PB: predicated region body
PF: predicated region fallthrough
CT: control target
= control target key end

     0   :  { %vm50_vm0 = vcmask 261120   ;;  %vm160_vm1 = vcmask 257024   ;;  %s309_s1 = inlined_call_operand.vmem [shape: bf16[32,32], index: 1, kind: input, shape index: {}]   ;;  %s310_s0 = inlined_call_operand.vmem [shape: f32[64,32], index: 0, kind: input, shape index: {}]   ;;  %s311_s2 = inlined_call_operand.vmem [shape: f32[1,32], index: 2, kind: input, shape index: {}]   ;;  %s312_s3 = inlined_call_operand.vmem [shape: bf16[64,32], index: 3, kind: output, shape index: {}]  }
   0x1   :  { %v218_v0 = vld [vmem:[%s309_s1 + $0x8] sm:$0xff]   ;;  %v219_v1 = vld [vmem:[%s309_s1] sm:$0xff]   ;;  %v17_v7 = vld [vmem:[%s310_s0 + $0x10] sm:$0xff] }
   0x2   :  { %202 = vmatprep.subr.bf16.mxu0 %v218_v0  ;;  %214 = vmatprep.subr.bf16.mxu1 %v218_v0  ;;  %v15_v2 = vld [vmem:[%s310_s0] sm:$0xff]  ;;  %v16_v3 = vld [vmem:[%s310_s0 + $0x8] sm:$0xff]  ;;  %v18_v8 = vld [vmem:[%s310_s0 + $0x18] sm:$0xff] }
   0x3   :  { %v19_v4 = vld [vmem:[%s310_s0 + $0x20] sm:$0xff]  ;;  %203 = vmatpush3.bf16.msra.mxu0 %v218_v0  ;;  %216 = vmatpush3.bf16.msra.mxu1 %v218_v0  ;;  %v23_v5 = vpack.c.bf16 %v16_v3, %v15_v2  ;;  %v20_v6 = vld [vmem:[%s310_s0 + $0x28] sm:$0xff]  ;;  %v21_v10 = vld [vmem:[%s310_s0 + $0x30] sm:$0xff]  ;;  %v24_v12 = vpack.c.bf16 %v18_v8, %v17_v7 }
   0x4   :  { %204 = vmatprep.subr.bf16.mxu0 %v219_v1  ;;  %215 = vmatprep.subr.bf16.mxu1 %v219_v1  ;;  %v25_v9 = vpack.c.bf16 %v20_v6, %v19_v4  ;;  %v22_v11 = vld [vmem:[%s310_s0 + $0x38] sm:$0xff]  ;;  %v173_v14 = vld [vmem:[%s311_s2] ss:$0 sm:$0xff] }
   0x5   :  { %206 = vmatprep.mubr.msk.bf16.mxu0 %vm50_vm0, %v23_v5  ;;  %v26_v13 = vpack.c.bf16 %v22_v11, %v21_v10 }
   0x6   :  { %210 = vmatprep.mubr.msk.bf16.mxu1 %vm50_vm0, %v25_v9 }
   0x7   :  { %205 = vmatpush3.bf16.msra.mxu0 %v219_v1  ;;  %217 = vmatpush3.bf16.msra.mxu1 %v219_v1 }
   0xa   :  { %207 = vmatmul.mubr.msk.bf16.vlgmr.msra.gmra.mxu0 %vm50_vm0, %v24_v12  ;;  %211 = vmatmul.mubr.msk.bf16.vlgmr.msra.gmra.mxu1 %vm50_vm0, %v26_v13 }
  0xca   :  { %v208_v15 = vpop.f32.mrf.mxu0  ;;  %v212_v16 = vpop.f32.mrf.mxu1 }
  0xcb   :  { %v106_v17 = vadd.f32 %v208_v15, %v173_v14  ;;  %v122_v18 = vadd.f32 %v212_v16, %v173_v14 }
  0xcc   :  { %v97_v19 = vpop.f32.mrf.mxu0  ;;  %v113_v20 = vpop.f32.mrf.mxu1 }
  0xcd   :  { %v190_v21 = vpack.c.bf16 %v106_v17, %v106_v17  ;;  %v194_v22 = vpack.c.bf16 %v122_v18, %v122_v18  ;;  %v98_v23 = vadd.f32 %v173_v14, %v97_v19  ;;  %v114_v24 = vadd.f32 %v173_v14, %v113_v20 }
  0xce   :  { %v209_v25 = vpop.f32.mrf.mxu0  ;;  %v213_v26 = vpop.f32.mrf.mxu1 }
  0xcf   :  { %163 = vst.msk [vmem:[%s312_s3 + $0x8] sm:$0xf] %vm160_vm1, %v190_v21  ;;  %167 = vst.msk [vmem:[%s312_s3 + $0x18] sm:$0xf] %vm160_vm1, %v194_v22  ;;  %v188_v27 = vpack.c.bf16 %v98_v23, %v98_v23  ;;  %v192_v28 = vpack.c.bf16 %v114_v24, %v114_v24  ;;  %v109_v29 = vadd.f32 %v209_v25, %v173_v14 }
  0xd0   :  { %v125_v30 = vadd.f32 %v213_v26, %v173_v14  ;;  %v100_v31 = vpop.f32.mrf.mxu0  ;;  %v116_v32 = vpop.f32.mrf.mxu1 }
  0xd1   :  { %161 = vst.msk [vmem:[%s312_s3] sm:$0xf] %vm160_vm1, %v188_v27  ;;  %165 = vst.msk [vmem:[%s312_s3 + $0x10] sm:$0xf] %vm160_vm1, %v192_v28  ;;  %v191_v33 = vpack.c.bf16 %v109_v29, %v109_v29  ;;  %v101_v35 = vadd.f32 %v173_v14, %v100_v31  ;;  %v117_v36 = vadd.f32 %v173_v14, %v116_v32 }
  0xd2   :  { %v195_v34 = vpack.c.bf16 %v125_v30, %v125_v30 }
  0xd3   :  { %164 = vst.msk [vmem:[%s312_s3 + $0xc] sm:$0xf] %vm160_vm1, %v191_v33  ;;  %v189_v37 = vpack.c.bf16 %v101_v35, %v101_v35  ;;  %v193_v38 = vpack.c.bf16 %v117_v36, %v117_v36 }
  0xd4   :  { %168 = vst.msk [vmem:[%s312_s3 + $0x1c] sm:$0xf] %vm160_vm1, %v195_v34 }
  0xd5   :  { %162 = vst.msk [vmem:[%s312_s3 + $0x4] sm:$0xf] %vm160_vm1, %v189_v37  ;;  %166 = vst.msk [vmem:[%s312_s3 + $0x14] sm:$0xf] %vm160_vm1, %v193_v38 }

</bundles_post_ra>
